<compile_context>
chip_gen: v5e
topology: v5e:2x2
jax: 0.10.0
libtpu: 0.0.40
codegen_flags: <defaults>
</compile_context>

<pallas_src>
import functools
import math

import jax
import jax.numpy as jnp
import numpy as np
from jax import lax
from jax.experimental import pallas as pl
from jax.experimental.pallas import tpu as pltpu

LEAKY_SLOPE = 0.01   # nn.LeakyReLU default negative_slope
GN_EPS = 1e-5        # nn.GroupNorm default eps
LANE = 128


def _round_up(x, m):
    return (x + m - 1) // m * m


def _vmem_capacity_bytes():
    """Per-core VMEM capacity (generation aware), conservative fallback."""
    try:
        info = pltpu.get_tpu_info()
        cap = int(getattr(info, "vmem_capacity_bytes", 0) or 0)
        if cap > 0:
            return min(cap, 128 << 20)
    except Exception:
        pass
    return 64 << 20      # conservative: assume v7x-sized VMEM per core


def _pick_rows_pass1(ho, wo, row_in_bytes, row_out_bytes, fixed_bytes, budget):
    """Rows-per-tile for pass 1.  Returns (TR, Ho_pad)."""
    step = 8 // math.gcd(wo, 8)        # smallest TR with (TR*Wo) % 8 == 0

    def cost(tr):
        return fixed_bytes + 2 * tr * row_in_bytes + 2 * tr * row_out_bytes

    # Prefer exact divisors of Ho (no padded rows).
    divs = [d for d in range(step, ho + 1, step)
            if ho % d == 0 and cost(d) <= budget]
    if divs:
        return max(divs), ho
    # Otherwise pad Ho up to a multiple of the best tile that fits the budget.
    ho_ceil = _round_up(max(ho, step), step)
    cands = [t for t in range(step, ho_ceil + 1, step) if cost(t) <= budget]
    if cands:
        tr = min(cands, key=lambda t: (_round_up(ho, t), -t))
    else:
        tr = step
    return tr, _round_up(ho, tr)


def _pick_rows_pass2(ho_pad, tr1, wo, row_bytes, fixed_bytes, budget):
    """Rows-per-tile for streaming pass 2 (a multiple of pass 1's tile)."""
    t1 = ho_pad // tr1
    best = tr1
    for d in range(1, t1 + 1):
        if t1 % d:
            continue
        rows = tr1 * d
        if fixed_bytes + 2 * rows * row_bytes <= budget:
            best = max(best, rows)
    return best


def _make_conv_stats_kernel(offs, wo, n_taps):
    """Pass 1: 3x3 conv as accumulated matmul(s) + per-tile group partial stats."""

    def kernel(xw_ref, w_ref, sel_ref, y_ref, ssum_ref, ssq_ref):
        tr = xw_ref.shape[1]
        kc = xw_ref.shape[3]
        m = tr * wo

        def tap(k):
            # Static, contiguous slice of the VMEM tile -> (TR*Wo, K).
            # TODO(synk): verify with pl.lower_as_mlir that the unaligned column
            # taps (offsets 1,2 on the sublane axis) don't materialize relayout
            # copies; if they do, matmul the full width and combine with
            # pltpu.roll instead.
            return xw_ref[0, :, offs[k]:offs[k] + wo, :].reshape(m, kc)

        # Accumulate directly into the f32 output block: no scratch accumulator.
        y_ref[0] = jnp.dot(tap(0), w_ref[0], preferred_element_type=jnp.float32)
        for k in range(1, n_taps):
            y_ref[0] += jnp.dot(tap(k), w_ref[k],
                                preferred_element_type=jnp.float32)

        acc = y_ref[0]
        ch_sum = jnp.sum(acc, axis=0, keepdims=True)          # (1, Cpad)
        ch_sq = jnp.sum(acc * acc, axis=0, keepdims=True)     # (1, Cpad)
        sel = sel_ref[...]                                     # (G, Cpad)
        # Per-tile partials (no cross-tile accumulation -> both grid axes are
        # "parallel"; the tiny (T, G) reduction happens in pass 2).
        g_sum = jnp.sum(ch_sum * sel, axis=1, keepdims=True)  # (G, 1)
        g_sq = jnp.sum(ch_sq * sel, axis=1, keepdims=True)    # (G, 1)
        ssum_ref[...] = g_sum[None, None]
        ssq_ref[...] = g_sq[None, None]

    return kernel


def _make_norm_kernel(n_per_group, t_blocks):
    """Pass 2: reduce per-tile stats, finalize GroupNorm, affine + LeakyReLU."""
    inv_n = 1.0 / float(n_per_group)

    def kernel(y_ref, ssum_ref, ssq_ref, sel_ref, gamma_ref, beta_ref, o_ref):
        acc = y_ref[0].astype(jnp.float32)                     # (M2, Cpad)
        # Tiny (T, G) partial-stats reduction, unrolled (T = #pass-1 row tiles).
        g_sum = ssum_ref[0, 0]                                 # (G, 1)
        g_sq = ssq_ref[0, 0]
        for t in range(1, t_blocks):
            g_sum = g_sum + ssum_ref[0, t]
            g_sq = g_sq + ssq_ref[0, t]
        mean_g = g_sum * inv_n
        var_g = jnp.maximum(g_sq * inv_n - mean_g * mean_g, 0.0)
        inv_g = lax.rsqrt(var_g + GN_EPS)
        sel = sel_ref[...]                                      # (G, Cpad)
        mean_c = jnp.sum(mean_g * sel, axis=0, keepdims=True)   # (1, Cpad)
        scale_c = jnp.sum(inv_g * sel, axis=0, keepdims=True)   # (1, Cpad)
        y = (acc - mean_c) * (scale_c * gamma_ref[...]) + beta_ref[...]
        o_ref[0] = jnp.where(y > 0, y, LEAKY_SLOPE * y).astype(o_ref.dtype)

    return kernel


def conv3x3_gn_lrelu(x_nhwc, w_oihw, gamma, beta, *, stride, num_groups,
                     matmul_dtype=jnp.bfloat16, out_dtype=jnp.float32,
                     return_padded=False):
    """One Conv2d(k=3, pad=1, bias=False) + GroupNorm + LeakyReLU layer."""
    N, H, W, Cin = x_nhwc.shape
    Cout, Cin_w, KH, KW = w_oihw.shape
    assert KH == 3 and KW == 3
    assert Cin_w <= Cin
    assert Cout % num_groups == 0, "GroupNorm requires Cout % num_groups == 0"
    if Cin_w < Cin:   # input carries zero lane-padding channels -> zero weight rows
        w_oihw = jnp.pad(w_oihw, ((0, 0), (0, Cin - Cin_w), (0, 0), (0, 0)))
    G = num_groups
    Ho = (H - 1) // stride + 1       # == floor((H + 2 - 3)/stride) + 1 (PyTorch)
    Wo = (W - 1) // stride + 1
    Cpad = _round_up(Cout, LANE)
    isz = jnp.dtype(matmul_dtype).itemsize
    osz = jnp.dtype(out_dtype).itemsize

    # ---- wrapper-side layout glue (plain XLA, once per layer) --------------
    xp = jnp.pad(x_nhwc, ((0, 0), (1, 1), (1, 1), (0, 0)))
    merge_taps = (3 * Cin) <= 128     # single K=9*Cin matmul fills the MXU better
    if merge_taps:
        # Full im2col (K = 9*Cin); only for small Cin so the 9x blowup is tiny.
        r = (np.arange(Ho)[:, None] * stride + np.arange(3)[None, :]).reshape(-1)
        c = (np.arange(Wo)[:, None] * stride + np.arange(3)[None, :]).reshape(-1)
        xw = xp[:, r][:, :, c]                                  # (N, 3Ho, 3Wo, Cin)
        xw = xw.reshape(N, Ho, 3, Wo, 3, Cin)
        xw = jnp.transpose(xw, (0, 1, 3, 2, 4, 5)).reshape(N, Ho, Wo, 9 * Cin)
        K = 9 * Cin
        n_taps, offs, Wwin = 1, (0,), Wo
        w_m = jnp.transpose(w_oihw, (2, 3, 1, 0)).reshape(1, K, Cout)
    else:
        # Row-windowed layout (K = 3*Cin); ~3x input bytes instead of 9x.
        # TODO(synk): replace with in-kernel halo-row DMAs (memory_space=pl.ANY)
        # to cut the input HBM read to ~1x, and/or emit layer 2 directly from the
        # resident layer-1 row tile.
        Wp = W + 2
        if stride > 1:
            col_perm = np.concatenate([np.arange(p, Wp, stride)
                                       for p in range(stride)])
            sizes = [len(np.arange(p, Wp, stride)) for p in range(stride)]
            starts = np.cumsum([0] + sizes)
            offs = tuple(int(starts[k % stride] + k // stride) for k in range(3))
            xp = xp[:, :, col_perm, :]
        else:
            offs = (0, 1, 2)
        row_idx = (np.arange(Ho)[:, None] * stride
                   + np.arange(3)[None, :]).reshape(-1)
        xw = xp[:, row_idx, :, :].reshape(N, Ho, 3, Wp, Cin)
        xw = jnp.transpose(xw, (0, 1, 3, 2, 4)).reshape(N, Ho, Wp, 3 * Cin)
        K = 3 * Cin
        n_taps, Wwin = 3, Wp
        w_m = jnp.transpose(w_oihw, (3, 2, 1, 0)).reshape(3, K, Cout)

    xw = xw.astype(matmul_dtype)
    w_m = jnp.pad(w_m, ((0, 0), (0, 0), (0, Cpad - Cout))).astype(matmul_dtype)
    gamma_p = jnp.pad(gamma.astype(jnp.float32), (0, Cpad - Cout)).reshape(1, Cpad)
    beta_p = jnp.pad(beta.astype(jnp.float32), (0, Cpad - Cout)).reshape(1, Cpad)
    sel_np = np.zeros((G, Cpad), np.float32)
    cg = Cout // G
    for gi in range(G):
        sel_np[gi, gi * cg:(gi + 1) * cg] = 1.0
    sel = jnp.asarray(sel_np)                     # (G, Cpad) one-hot, built once

    # ---- generation-aware tile sizing ---------------------------------------
    cap = _vmem_capacity_bytes()
    budget = int(cap * 0.35)
    w_blk = n_taps * K * Cpad * isz
    fixed1 = 2 * w_blk + 2 * G * Cpad * 4 + 4 * G * 4   # weights(x2) + sel + stats
    row_in = Wwin * K * isz
    row_out = Wo * Cpad * 4
    slack_row = Wo * K * isz                      # possible tap-slice relayout copy
    TR, Ho_pad = _pick_rows_pass1(Ho, Wo, row_in + slack_row, row_out,
                                  fixed1, budget)
    if Ho_pad > Ho:                               # zero rows: no effect on stats
        xw = jnp.pad(xw, ((0, 0), (0, Ho_pad - Ho), (0, 0), (0, 0)))
    T = Ho_pad // TR
    M = TR * Wo
    P_pad = Ho_pad * Wo

    need1 = fixed1 + 2 * TR * (row_in + slack_row) + 2 * TR * row_out
    vmem1 = int(min(cap * 3 // 4, max(need1 * 3 // 2 + (8 << 20), 32 << 20)))
    cost1 = pl.CostEstimate(
        flops=int(2 * N * P_pad * n_taps * K * Cpad), transcendentals=0,
        bytes_accessed=int(xw.size * isz + w_m.size * isz + N * P_pad * Cpad * 4))

    # ---- pass 1: conv matmul(s) + per-tile group partial stats --------------
    y_raw, part_sum, part_sq = pl.pallas_call(
        _make_conv_stats_kernel(offs, Wo, n_taps),
        out_shape=(
            jax.ShapeDtypeStruct((N, P_pad, Cpad), jnp.float32),
            jax.ShapeDtypeStruct((N, T, G, 1), jnp.float32),
            jax.ShapeDtypeStruct((N, T, G, 1), jnp.float32),
        ),
        grid_spec=pltpu.PrefetchScalarGridSpec(
            num_scalar_prefetch=0,
            grid=(N, T),
            in_specs=[
                pl.BlockSpec((1, TR, Wwin, K), lambda n, t: (n, t, 0, 0)),
                pl.BlockSpec((n_taps, K, Cpad), lambda n, t: (0, 0, 0)),
                pl.BlockSpec((G, Cpad), lambda n, t: (0, 0)),
            ],
            out_specs=[
                pl.BlockSpec((1, M, Cpad), lambda n, t: (n, t, 0)),
                pl.BlockSpec((1, 1, G, 1), lambda n, t: (n, t, 0, 0)),
                pl.BlockSpec((1, 1, G, 1), lambda n, t: (n, t, 0, 0)),
            ],
        ),
        compiler_params=pltpu.CompilerParams(
            dimension_semantics=("parallel", "parallel"),
            vmem_limit_bytes=vmem1),
        cost_estimate=cost1,
    )(xw, w_m, sel)

    # ---- pass 2: streaming GroupNorm finalize + affine + LeakyReLU ----------
    row2 = Wo * Cpad * (4 + osz)
    fixed2 = 4 * T * G * 4 + G * Cpad * 4 + 2 * Cpad * 4
    R2 = _pick_rows_pass2(Ho_pad, TR, Wo, row2, fixed2, budget)
    T2 = Ho_pad // R2
    M2 = R2 * Wo
    need2 = fixed2 + 2 * M2 * Cpad * (4 + osz)
    vmem2 = int(min(cap * 3 // 4, max(need2 * 3 // 2 + (8 << 20), 32 << 20)))
    n_per_group = Ho * Wo * (Cout // G)           # real pixels only
    cost2 = pl.CostEstimate(
        flops=int(6 * N * P_pad * Cpad), transcendentals=int(N * T2 * G),
        bytes_accessed=int(N * P_pad * Cpad * (4 + osz)))
    # In-place normalize of the raw conv buffer (forward-only) when dtypes match.
    alias = {0: 0} if jnp.dtype(out_dtype) == jnp.dtype(jnp.float32) else {}

    out = pl.pallas_call(
        _make_norm_kernel(n_per_group, T),
        out_shape=jax.ShapeDtypeStruct((N, P_pad, Cpad), out_dtype),
        grid_spec=pltpu.PrefetchScalarGridSpec(
            num_scalar_prefetch=0,
            grid=(N, T2),
            in_specs=[
                pl.BlockSpec((1, M2, Cpad), lambda n, t: (n, t, 0)),
                pl.BlockSpec((1, T, G, 1), lambda n, t: (n, 0, 0, 0)),
                pl.BlockSpec((1, T, G, 1), lambda n, t: (n, 0, 0, 0)),
                pl.BlockSpec((G, Cpad), lambda n, t: (0, 0)),
                pl.BlockSpec((1, Cpad), lambda n, t: (0, 0)),
                pl.BlockSpec((1, Cpad), lambda n, t: (0, 0)),
            ],
            out_specs=pl.BlockSpec((1, M2, Cpad), lambda n, t: (n, t, 0)),
        ),
        compiler_params=pltpu.CompilerParams(
            dimension_semantics=("parallel", "parallel"),
            vmem_limit_bytes=vmem2),
        cost_estimate=cost2,
        input_output_aliases=alias,
    )(y_raw, part_sum, part_sq, sel, gamma_p, beta_p)

    out = out.reshape(N, Ho_pad, Wo, Cpad)
    if Ho_pad > Ho:
        out = out[:, :Ho]
    if not return_padded:
        out = out[..., :Cout]      # pad channels are exactly zero when kept
    return out


def double_conv_forward(x_nchw, params, *, first_stride, num_groups,
                        matmul_dtype=jnp.bfloat16):
    """Forward pass of DoubleConv.  Input/output are NCHW like PyTorch."""
    x = jnp.transpose(x_nchw, (0, 2, 3, 1))      # NCHW -> NHWC
    cout = params["w1"].shape[0]
    # Carry the lane-padded channel layout between layers only when it is free
    # (Cout already a multiple of 128); otherwise slicing beats a padded K.
    keep_pad = (cout % LANE == 0)
    x = conv3x3_gn_lrelu(x, params["w1"], params["g1"], params["b1"],
                         stride=first_stride, num_groups=num_groups,
                         matmul_dtype=matmul_dtype, out_dtype=matmul_dtype,
                         return_padded=keep_pad)
    x = conv3x3_gn_lrelu(x, params["w2"], params["g2"], params["b2"],
                         stride=1, num_groups=num_groups,
                         matmul_dtype=matmul_dtype, out_dtype=jnp.float32,
                         return_padded=False)
    return jnp.transpose(x, (0, 3, 1, 2))        # NHWC -> NCHW


# ------------------------- pure-JAX reference --------------------------------
def _ref_layer(x_nchw, w, gamma, beta, stride, groups):
    y = lax.conv_general_dilated(x_nchw, w, (stride, stride), ((1, 1), (1, 1)),
                                 dimension_numbers=("NCHW", "OIHW", "NCHW"))
    N, C, H, W = y.shape
    yg = y.reshape(N, groups, (C // groups) * H * W)
    mean = yg.mean(axis=-1, keepdims=True)
    var = yg.var(axis=-1, keepdims=True)
    yn = ((yg - mean) / jnp.sqrt(var + GN_EPS)).reshape(N, C, H, W)
    yn = yn * gamma[None, :, None, None] + beta[None, :, None, None]
    return jnp.where(yn > 0, yn, LEAKY_SLOPE * yn)


def double_conv_ref(x_nchw, params, *, first_stride, num_groups):
    y = _ref_layer(x_nchw, params["w1"], params["g1"], params["b1"],
                   first_stride, num_groups)
    y = _ref_layer(y, params["w2"], params["g2"], params["b2"], 1, num_groups)
    return y


if __name__ == "__main__":
    N, Cin, H, W = 2, 4, 16, 16
    Cout = 8
    first_stride = 2
    num_groups = 2

    key = jax.random.PRNGKey(0)
    k1, k2, k3, k4, k5, k6, kx = jax.random.split(key, 7)
    params = {
        "w1": 0.2 * jax.random.normal(k1, (Cout, Cin, 3, 3), jnp.float32),
        "g1": 1.0 + 0.1 * jax.random.normal(k2, (Cout,), jnp.float32),
        "b1": 0.1 * jax.random.normal(k3, (Cout,), jnp.float32),
        "w2": 0.2 * jax.random.normal(k4, (Cout, Cout, 3, 3), jnp.float32),
        "g2": 1.0 + 0.1 * jax.random.normal(k5, (Cout,), jnp.float32),
        "b2": 0.1 * jax.random.normal(k6, (Cout,), jnp.float32),
    }
    x = jax.random.normal(kx, (N, Cin, H, W), jnp.float32)

    # f32 MXU path: exact-parity correctness gate vs the pure-JAX reference.
    fwd = jax.jit(functools.partial(double_conv_forward,
                                    first_stride=first_stride,
                                    num_groups=num_groups,
                                    matmul_dtype=jnp.float32))
    out = jax.block_until_ready(fwd(x, params))

    ref = double_conv_ref(x, params, first_stride=first_stride,
                          num_groups=num_groups)
    assert out.shape == ref.shape == (N, Cout, H // first_stride, W // first_stride)
    assert jnp.allclose(out, ref, rtol=1e-4, atol=1e-4), "mismatch vs reference"

    # Default bf16 fast path (recommended on v6e/v7x; GroupNorm math stays f32).
    # Documented precision tradeoff: checked for shape/finiteness only.
    try:
        fwd_bf16 = jax.jit(functools.partial(double_conv_forward,
                                             first_stride=first_stride,
                                             num_groups=num_groups))
        out_bf16 = jax.block_until_ready(fwd_bf16(x, params))
        assert out_bf16.shape == ref.shape
        assert bool(jnp.all(jnp.isfinite(out_bf16)))
    except Exception:  # optional perf path only; the f32 path is the success gate
        pass

    print("KERNEL_OK")
</pallas_src>

<mosaic_0001>
module attributes {stable_mosaic.version = 11 : i64} {
  func.func @kernel(%arg0: i32, %arg1: i32, %arg2: memref<1x64x128xf32, #tpu.memory_space<vmem>>, %arg3: memref<1x1x2x1xf32, #tpu.memory_space<vmem>>, %arg4: memref<1x1x2x1xf32, #tpu.memory_space<vmem>>, %arg5: memref<2x128xf32, #tpu.memory_space<vmem>>, %arg6: memref<1x128xf32, #tpu.memory_space<vmem>>, %arg7: memref<1x128xf32, #tpu.memory_space<vmem>>, %arg8: memref<1x64x128xf32, #tpu.memory_space<vmem>>) attributes {dimension_semantics = [#tpu.dimension_semantics<parallel>, #tpu.dimension_semantics<parallel>], iteration_bounds = array<i64: 2, 1>, scalar_prefetch = 0 : i64, scratch_operands = 0 : i64, tpu.core_type = #tpu.core_type<tc>, window_params = [{transform_indices = @transform_0, window_bounds = array<i64: 1, 64, 128>}, {transform_indices = @transform_1, window_bounds = array<i64: 1, 1, 2, 1>}, {transform_indices = @transform_2, window_bounds = array<i64: 1, 1, 2, 1>}, {pipeline_mode = #tpu.pipeline_mode<synchronous>, transform_indices = @transform_3, window_bounds = array<i64: 2, 128>}, {pipeline_mode = #tpu.pipeline_mode<synchronous>, transform_indices = @transform_4, window_bounds = array<i64: 1, 128>}, {pipeline_mode = #tpu.pipeline_mode<synchronous>, transform_indices = @transform_5, window_bounds = array<i64: 1, 128>}, {transform_indices = @transform_6, window_bounds = array<i64: 1, 64, 128>}]} {
    %c0 = arith.constant 0 : index
    %c0_0 = arith.constant 0 : index
    %c0_1 = arith.constant 0 : index
    %0 = vector.load %arg2[%c0, %c0_0, %c0_1] : memref<1x64x128xf32, #tpu.memory_space<vmem>>, vector<1x64x128xf32>
    %1 = vector.shape_cast %0 : vector<1x64x128xf32> to vector<64x128xf32>
    %c0_2 = arith.constant 0 : index
    %c0_3 = arith.constant 0 : index
    %c0_4 = arith.constant 0 : index
    %c0_5 = arith.constant 0 : index
    %2 = vector.load %arg3[%c0_2, %c0_3, %c0_4, %c0_5] : memref<1x1x2x1xf32, #tpu.memory_space<vmem>>, vector<1x1x2x1xf32>
    %3 = vector.shape_cast %2 : vector<1x1x2x1xf32> to vector<2x1xf32>
    %c0_6 = arith.constant 0 : index
    %c0_7 = arith.constant 0 : index
    %c0_8 = arith.constant 0 : index
    %c0_9 = arith.constant 0 : index
    %4 = vector.load %arg4[%c0_6, %c0_7, %c0_8, %c0_9] : memref<1x1x2x1xf32, #tpu.memory_space<vmem>>, vector<1x1x2x1xf32>
    %5 = vector.shape_cast %4 : vector<1x1x2x1xf32> to vector<2x1xf32>
    %cst = arith.constant 3.906250e-03 : f32
    %6 = vector.broadcast %cst : f32 to vector<2x1xf32>
    %7 = arith.mulf %3, %6 : vector<2x1xf32>
    %cst_10 = arith.constant 3.906250e-03 : f32
    %8 = vector.broadcast %cst_10 : f32 to vector<2x1xf32>
    %9 = arith.mulf %5, %8 : vector<2x1xf32>
    %10 = arith.mulf %7, %7 : vector<2x1xf32>
    %11 = arith.subf %9, %10 : vector<2x1xf32>
    %cst_11 = arith.constant 0.000000e+00 : f32
    %12 = vector.broadcast %cst_11 : f32 to vector<2x1xf32>
    %13 = arith.maximumf %11, %12 : vector<2x1xf32>
    %cst_12 = arith.constant 9.99999974E-6 : f32
    %14 = vector.broadcast %cst_12 : f32 to vector<2x1xf32>
    %15 = arith.addf %13, %14 : vector<2x1xf32>
    %16 = math.rsqrt %15 : vector<2x1xf32>
    %c0_13 = arith.constant 0 : index
    %c0_14 = arith.constant 0 : index
    %17 = vector.load %arg5[%c0_13, %c0_14] : memref<2x128xf32, #tpu.memory_space<vmem>>, vector<2x128xf32>
    %18 = vector.broadcast %7 : vector<2x1xf32> to vector<2x128xf32>
    %19 = arith.mulf %18, %17 : vector<2x128xf32>
    %cst_15 = arith.constant dense<0.000000e+00> : vector<128xf32>
    %20 = vector.multi_reduction <add>, %19, %cst_15 [0] : vector<2x128xf32> to vector<128xf32>
    %21 = vector.shape_cast %20 : vector<128xf32> to vector<1x128xf32>
    %22 = vector.broadcast %16 : vector<2x1xf32> to vector<2x128xf32>
    %23 = arith.mulf %22, %17 : vector<2x128xf32>
    %cst_16 = arith.constant dense<0.000000e+00> : vector<128xf32>
    %24 = vector.multi_reduction <add>, %23, %cst_16 [0] : vector<2x128xf32> to vector<128xf32>
    %25 = vector.shape_cast %24 : vector<128xf32> to vector<1x128xf32>
    %26 = vector.broadcast %21 : vector<1x128xf32> to vector<64x128xf32>
    %27 = arith.subf %1, %26 : vector<64x128xf32>
    %c0_17 = arith.constant 0 : index
    %c0_18 = arith.constant 0 : index
    %28 = vector.load %arg6[%c0_17, %c0_18] : memref<1x128xf32, #tpu.memory_space<vmem>>, vector<1x128xf32>
    %29 = arith.mulf %25, %28 : vector<1x128xf32>
    %30 = vector.broadcast %29 : vector<1x128xf32> to vector<64x128xf32>
    %31 = arith.mulf %27, %30 : vector<64x128xf32>
    %c0_19 = arith.constant 0 : index
    %c0_20 = arith.constant 0 : index
    %32 = vector.load %arg7[%c0_19, %c0_20] : memref<1x128xf32, #tpu.memory_space<vmem>>, vector<1x128xf32>
    %33 = vector.broadcast %32 : vector<1x128xf32> to vector<64x128xf32>
    %34 = arith.addf %31, %33 : vector<64x128xf32>
    %cst_21 = arith.constant 0.000000e+00 : f32
    %35 = vector.broadcast %cst_21 : f32 to vector<64x128xf32>
    %36 = arith.cmpf ogt, %34, %35 : vector<64x128xf32>
    %cst_22 = arith.constant 0.00999999977 : f32
    %37 = vector.broadcast %cst_22 : f32 to vector<64x128xf32>
    %38 = arith.mulf %37, %34 : vector<64x128xf32>
    %39 = arith.select %36, %34, %38 : vector<64x128xi1>, vector<64x128xf32>
    %c0_23 = arith.constant 0 : index
    %c0_24 = arith.constant 0 : index
    %c0_25 = arith.constant 0 : index
    %40 = vector.load %arg8[%c0_23, %c0_24, %c0_25] : memref<1x64x128xf32, #tpu.memory_space<vmem>>, vector<1x64x128xf32>
    %41 = vector.shape_cast %40 : vector<1x64x128xf32> to vector<64x128xf32>
    %42 = vector.shape_cast %39 : vector<64x128xf32> to vector<1x64x128xf32>
    tpu.vector_store %arg8[%c0_23, %c0_24, %c0_25], %42 {strides = array<i32>} : memref<1x64x128xf32, #tpu.memory_space<vmem>>, vector<1x64x128xf32>,
    return
  }
  func.func @transform_0(%arg0: i32, %arg1: i32) -> (i32, i32, i32) {
    %c0_i32 = arith.constant 0 : i32
    %c0_i32_0 = arith.constant 0 : i32
    return %arg0, %arg1, %c0_i32 : i32, i32, i32
  }
  func.func @transform_1(%arg0: i32, %arg1: i32) -> (i32, i32, i32, i32) {
    %c0_i32 = arith.constant 0 : i32
    %c0_i32_0 = arith.constant 0 : i32
    %c0_i32_1 = arith.constant 0 : i32
    %c0_i32_2 = arith.constant 0 : i32
    return %arg0, %c0_i32, %c0_i32_0, %c0_i32_1 : i32, i32, i32, i32
  }
  func.func @transform_2(%arg0: i32, %arg1: i32) -> (i32, i32, i32, i32) {
    %c0_i32 = arith.constant 0 : i32
    %c0_i32_0 = arith.constant 0 : i32
    %c0_i32_1 = arith.constant 0 : i32
    %c0_i32_2 = arith.constant 0 : i32
    return %arg0, %c0_i32, %c0_i32_0, %c0_i32_1 : i32, i32, i32, i32
  }
  func.func @transform_3(%arg0: i32, %arg1: i32) -> (i32, i32) {
    %c0_i32 = arith.constant 0 : i32
    %c0_i32_0 = arith.constant 0 : i32
    %c0_i32_1 = arith.constant 0 : i32
    return %c0_i32, %c0_i32_0 : i32, i32
  }
  func.func @transform_4(%arg0: i32, %arg1: i32) -> (i32, i32) {
    %c0_i32 = arith.constant 0 : i32
    %c0_i32_0 = arith.constant 0 : i32
    %c0_i32_1 = arith.constant 0 : i32
    return %c0_i32, %c0_i32_0 : i32, i32
  }
  func.func @transform_5(%arg0: i32, %arg1: i32) -> (i32, i32) {
    %c0_i32 = arith.constant 0 : i32
    %c0_i32_0 = arith.constant 0 : i32
    %c0_i32_1 = arith.constant 0 : i32
    return %c0_i32, %c0_i32_0 : i32, i32
  }
  func.func @transform_6(%arg0: i32, %arg1: i32) -> (i32, i32, i32) {
    %c0_i32 = arith.constant 0 : i32
    %c0_i32_0 = arith.constant 0 : i32
    return %arg0, %arg1, %c0_i32 : i32, i32, i32
  }
}

module attributes {stable_mosaic.version = 11 : i64} {
  func.func @kernel(%arg0: i32, %arg1: i32, %arg2: memref<1x8x8x36xf32, #tpu.memory_space<vmem>>, %arg3: memref<1x36x128xf32, #tpu.memory_space<vmem>>, %arg4: memref<2x128xf32, #tpu.memory_space<vmem>>, %arg5: memref<1x64x128xf32, #tpu.memory_space<vmem>>, %arg6: memref<1x1x2x1xf32, #tpu.memory_space<vmem>>, %arg7: memref<1x1x2x1xf32, #tpu.memory_space<vmem>>) attributes {dimension_semantics = [#tpu.dimension_semantics<parallel>, #tpu.dimension_semantics<parallel>], iteration_bounds = array<i64: 2, 1>, scalar_prefetch = 0 : i64, scratch_operands = 0 : i64, tpu.core_type = #tpu.core_type<tc>, window_params = [{transform_indices = @transform_0, window_bounds = array<i64: 1, 8, 8, 36>}, {pipeline_mode = #tpu.pipeline_mode<synchronous>, transform_indices = @transform_1, window_bounds = array<i64: 1, 36, 128>}, {pipeline_mode = #tpu.pipeline_mode<synchronous>, transform_indices = @transform_2, window_bounds = array<i64: 2, 128>}, {transform_indices = @transform_3, window_bounds = array<i64: 1, 64, 128>}, {transform_indices = @transform_4, window_bounds = array<i64: 1, 1, 2, 1>}, {transform_indices = @transform_5, window_bounds = array<i64: 1, 1, 2, 1>}]} {
    %c0 = arith.constant 0 : index
    %c0_0 = arith.constant 0 : index
    %c0_1 = arith.constant 0 : index
    %c0_2 = arith.constant 0 : index
    %0 = vector.load %arg2[%c0, %c0_0, %c0_1, %c0_2] : memref<1x8x8x36xf32, #tpu.memory_space<vmem>>, vector<1x8x8x36xf32>
    %1 = vector.shape_cast %0 : vector<1x8x8x36xf32> to vector<8x8x36xf32>
    %2 = vector.shape_cast %1 : vector<8x8x36xf32> to vector<64x36xf32>
    %c0_3 = arith.constant 0 : index
    %c0_4 = arith.constant 0 : index
    %c0_5 = arith.constant 0 : index
    %3 = vector.load %arg3[%c0_3, %c0_4, %c0_5] : memref<1x36x128xf32, #tpu.memory_space<vmem>>, vector<1x36x128xf32>
    %4 = vector.shape_cast %3 : vector<1x36x128xf32> to vector<36x128xf32>
    %cst = arith.constant dense<0.000000e+00> : vector<64x128xf32>
    %5 = tpu.matmul %2, %4, %cst {dimension_numbers = #tpu.dot_dimension_numbers<[1], [0], [0], [1], [0, 0, 1, 1], [], []>} : vector<64x36xf32>, vector<36x128xf32>, vector<64x128xf32> -> vector<64x128xf32>
    %c0_6 = arith.constant 0 : index
    %c0_7 = arith.constant 0 : index
    %c0_8 = arith.constant 0 : index
    %6 = vector.load %arg5[%c0_6, %c0_7, %c0_8] : memref<1x64x128xf32, #tpu.memory_space<vmem>>, vector<1x64x128xf32>
    %7 = vector.shape_cast %6 : vector<1x64x128xf32> to vector<64x128xf32>
    %8 = vector.shape_cast %5 : vector<64x128xf32> to vector<1x64x128xf32>
    tpu.vector_store %arg5[%c0_6, %c0_7, %c0_8], %8 {strides = array<i32>} : memref<1x64x128xf32, #tpu.memory_space<vmem>>, vector<1x64x128xf32>,
    %c0_9 = arith.constant 0 : index
    %c0_10 = arith.constant 0 : index
    %c0_11 = arith.constant 0 : index
    %9 = vector.load %arg5[%c0_9, %c0_10, %c0_11] : memref<1x64x128xf32, #tpu.memory_space<vmem>>, vector<1x64x128xf32>
    %10 = vector.shape_cast %9 : vector<1x64x128xf32> to vector<64x128xf32>
    %cst_12 = arith.constant dense<0.000000e+00> : vector<128xf32>
    %11 = vector.multi_reduction <add>, %10, %cst_12 [0] : vector<64x128xf32> to vector<128xf32>
    %12 = vector.shape_cast %11 : vector<128xf32> to vector<1x128xf32>
    %13 = arith.mulf %10, %10 : vector<64x128xf32>
    %cst_13 = arith.constant dense<0.000000e+00> : vector<128xf32>
    %14 = vector.multi_reduction <add>, %13, %cst_13 [0] : vector<64x128xf32> to vector<128xf32>
    %15 = vector.shape_cast %14 : vector<128xf32> to vector<1x128xf32>
    %c0_14 = arith.constant 0 : index
    %c0_15 = arith.constant 0 : index
    %16 = vector.load %arg4[%c0_14, %c0_15] : memref<2x128xf32, #tpu.memory_space<vmem>>, vector<2x128xf32>
    %17 = vector.broadcast %12 : vector<1x128xf32> to vector<2x128xf32>
    %18 = arith.mulf %17, %16 : vector<2x128xf32>
    %cst_16 = arith.constant dense<0.000000e+00> : vector<2xf32>
    %19 = vector.multi_reduction <add>, %18, %cst_16 [1] : vector<2x128xf32> to vector<2xf32>
    %20 = vector.shape_cast %19 : vector<2xf32> to vector<2x1xf32>
    %21 = vector.broadcast %15 : vector<1x128xf32> to vector<2x128xf32>
    %22 = arith.mulf %21, %16 : vector<2x128xf32>
    %cst_17 = arith.constant dense<0.000000e+00> : vector<2xf32>
    %23 = vector.multi_reduction <add>, %22, %cst_17 [1] : vector<2x128xf32> to vector<2xf32>
    %24 = vector.shape_cast %23 : vector<2xf32> to vector<2x1xf32>
    %25 = vector.shape_cast %20 : vector<2x1xf32> to vector<1x1x2x1xf32>
    %c0_18 = arith.constant 0 : index
    %c0_19 = arith.constant 0 : index
    %c0_20 = arith.constant 0 : index
    %c0_21 = arith.constant 0 : index
    %26 = vector.load %arg6[%c0_18, %c0_19, %c0_20, %c0_21] : memref<1x1x2x1xf32, #tpu.memory_space<vmem>>, vector<1x1x2x1xf32>
    tpu.vector_store %arg6[%c0_18, %c0_19, %c0_20, %c0_21], %25 {strides = array<i32>} : memref<1x1x2x1xf32, #tpu.memory_space<vmem>>, vector<1x1x2x1xf32>,
    %27 = vector.shape_cast %24 : vector<2x1xf32> to vector<1x1x2x1xf32>
    %c0_22 = arith.constant 0 : index
    %c0_23 = arith.constant 0 : index
    %c0_24 = arith.constant 0 : index
    %c0_25 = arith.constant 0 : index
    %28 = vector.load %arg7[%c0_22, %c0_23, %c0_24, %c0_25] : memref<1x1x2x1xf32, #tpu.memory_space<vmem>>, vector<1x1x2x1xf32>
    tpu.vector_store %arg7[%c0_22, %c0_23, %c0_24, %c0_25], %27 {strides = array<i32>} : memref<1x1x2x1xf32, #tpu.memory_space<vmem>>, vector<1x1x2x1xf32>,
    return
  }
  func.func @transform_0(%arg0: i32, %arg1: i32) -> (i32, i32, i32, i32) {
    %c0_i32 = arith.constant 0 : i32
    %c0_i32_0 = arith.constant 0 : i32
    %c0_i32_1 = arith.constant 0 : i32
    return %arg0, %arg1, %c0_i32, %c0_i32_0 : i32, i32, i32, i32
  }
  func.func @transform_1(%arg0: i32, %arg1: i32) -> (i32, i32, i32) {
    %c0_i32 = arith.constant 0 : i32
    %c0_i32_0 = arith.constant 0 : i32
    %c0_i32_1 = arith.constant 0 : i32
    %c0_i32_2 = arith.constant 0 : i32
    return %c0_i32, %c0_i32_0, %c0_i32_1 : i32, i32, i32
  }
  func.func @transform_2(%arg0: i32, %arg1: i32) -> (i32, i32) {
    %c0_i32 = arith.constant 0 : i32
    %c0_i32_0 = arith.constant 0 : i32
    %c0_i32_1 = arith.constant 0 : i32
    return %c0_i32, %c0_i32_0 : i32, i32
  }
  func.func @transform_3(%arg0: i32, %arg1: i32) -> (i32, i32, i32) {
    %c0_i32 = arith.constant 0 : i32
    %c0_i32_0 = arith.constant 0 : i32
    return %arg0, %arg1, %c0_i32 : i32, i32, i32
  }
  func.func @transform_4(%arg0: i32, %arg1: i32) -> (i32, i32, i32, i32) {
    %c0_i32 = arith.constant 0 : i32
    %c0_i32_0 = arith.constant 0 : i32
    %c0_i32_1 = arith.constant 0 : i32
    return %arg0, %arg1, %c0_i32, %c0_i32_0 : i32, i32, i32, i32
  }
  func.func @transform_5(%arg0: i32, %arg1: i32) -> (i32, i32, i32, i32) {
    %c0_i32 = arith.constant 0 : i32
    %c0_i32_0 = arith.constant 0 : i32
    %c0_i32_1 = arith.constant 0 : i32
    return %arg0, %arg1, %c0_i32, %c0_i32_0 : i32, i32, i32, i32
  }
}

module attributes {stable_mosaic.version = 11 : i64} {
  func.func @kernel(%arg0: i32, %arg1: i32, %arg2: memref<1x8x8x72xf32, #tpu.memory_space<vmem>>, %arg3: memref<1x72x128xf32, #tpu.memory_space<vmem>>, %arg4: memref<2x128xf32, #tpu.memory_space<vmem>>, %arg5: memref<1x64x128xf32, #tpu.memory_space<vmem>>, %arg6: memref<1x1x2x1xf32, #tpu.memory_space<vmem>>, %arg7: memref<1x1x2x1xf32, #tpu.memory_space<vmem>>) attributes {dimension_semantics = [#tpu.dimension_semantics<parallel>, #tpu.dimension_semantics<parallel>], iteration_bounds = array<i64: 2, 1>, scalar_prefetch = 0 : i64, scratch_operands = 0 : i64, tpu.core_type = #tpu.core_type<tc>, window_params = [{transform_indices = @transform_0, window_bounds = array<i64: 1, 8, 8, 72>}, {pipeline_mode = #tpu.pipeline_mode<synchronous>, transform_indices = @transform_1, window_bounds = array<i64: 1, 72, 128>}, {pipeline_mode = #tpu.pipeline_mode<synchronous>, transform_indices = @transform_2, window_bounds = array<i64: 2, 128>}, {transform_indices = @transform_3, window_bounds = array<i64: 1, 64, 128>}, {transform_indices = @transform_4, window_bounds = array<i64: 1, 1, 2, 1>}, {transform_indices = @transform_5, window_bounds = array<i64: 1, 1, 2, 1>}]} {
    %c0 = arith.constant 0 : index
    %c0_0 = arith.constant 0 : index
    %c0_1 = arith.constant 0 : index
    %c0_2 = arith.constant 0 : index
    %0 = vector.load %arg2[%c0, %c0_0, %c0_1, %c0_2] : memref<1x8x8x72xf32, #tpu.memory_space<vmem>>, vector<1x8x8x72xf32>
    %1 = vector.shape_cast %0 : vector<1x8x8x72xf32> to vector<8x8x72xf32>
    %2 = vector.shape_cast %1 : vector<8x8x72xf32> to vector<64x72xf32>
    %c0_3 = arith.constant 0 : index
    %c0_4 = arith.constant 0 : index
    %c0_5 = arith.constant 0 : index
    %3 = vector.load %arg3[%c0_3, %c0_4, %c0_5] : memref<1x72x128xf32, #tpu.memory_space<vmem>>, vector<1x72x128xf32>
    %4 = vector.shape_cast %3 : vector<1x72x128xf32> to vector<72x128xf32>
    %cst = arith.constant dense<0.000000e+00> : vector<64x128xf32>
    %5 = tpu.matmul %2, %4, %cst {dimension_numbers = #tpu.dot_dimension_numbers<[1], [0], [0], [1], [0, 0, 1, 1], [], []>} : vector<64x72xf32>, vector<72x128xf32>, vector<64x128xf32> -> vector<64x128xf32>
    %c0_6 = arith.constant 0 : index
    %c0_7 = arith.constant 0 : index
    %c0_8 = arith.constant 0 : index
    %6 = vector.load %arg5[%c0_6, %c0_7, %c0_8] : memref<1x64x128xf32, #tpu.memory_space<vmem>>, vector<1x64x128xf32>
    %7 = vector.shape_cast %6 : vector<1x64x128xf32> to vector<64x128xf32>
    %8 = vector.shape_cast %5 : vector<64x128xf32> to vector<1x64x128xf32>
    tpu.vector_store %arg5[%c0_6, %c0_7, %c0_8], %8 {strides = array<i32>} : memref<1x64x128xf32, #tpu.memory_space<vmem>>, vector<1x64x128xf32>,
    %c0_9 = arith.constant 0 : index
    %c0_10 = arith.constant 0 : index
    %c0_11 = arith.constant 0 : index
    %9 = vector.load %arg5[%c0_9, %c0_10, %c0_11] : memref<1x64x128xf32, #tpu.memory_space<vmem>>, vector<1x64x128xf32>
    %10 = vector.shape_cast %9 : vector<1x64x128xf32> to vector<64x128xf32>
    %cst_12 = arith.constant dense<0.000000e+00> : vector<128xf32>
    %11 = vector.multi_reduction <add>, %10, %cst_12 [0] : vector<64x128xf32> to vector<128xf32>
    %12 = vector.shape_cast %11 : vector<128xf32> to vector<1x128xf32>
    %13 = arith.mulf %10, %10 : vector<64x128xf32>
    %cst_13 = arith.constant dense<0.000000e+00> : vector<128xf32>
    %14 = vector.multi_reduction <add>, %13, %cst_13 [0] : vector<64x128xf32> to vector<128xf32>
    %15 = vector.shape_cast %14 : vector<128xf32> to vector<1x128xf32>
    %c0_14 = arith.constant 0 : index
    %c0_15 = arith.constant 0 : index
    %16 = vector.load %arg4[%c0_14, %c0_15] : memref<2x128xf32, #tpu.memory_space<vmem>>, vector<2x128xf32>
    %17 = vector.broadcast %12 : vector<1x128xf32> to vector<2x128xf32>
    %18 = arith.mulf %17, %16 : vector<2x128xf32>
    %cst_16 = arith.constant dense<0.000000e+00> : vector<2xf32>
    %19 = vector.multi_reduction <add>, %18, %cst_16 [1] : vector<2x128xf32> to vector<2xf32>
    %20 = vector.shape_cast %19 : vector<2xf32> to vector<2x1xf32>
    %21 = vector.broadcast %15 : vector<1x128xf32> to vector<2x128xf32>
    %22 = arith.mulf %21, %16 : vector<2x128xf32>
    %cst_17 = arith.constant dense<0.000000e+00> : vector<2xf32>
    %23 = vector.multi_reduction <add>, %22, %cst_17 [1] : vector<2x128xf32> to vector<2xf32>
    %24 = vector.shape_cast %23 : vector<2xf32> to vector<2x1xf32>
    %25 = vector.shape_cast %20 : vector<2x1xf32> to vector<1x1x2x1xf32>
    %c0_18 = arith.constant 0 : index
    %c0_19 = arith.constant 0 : index
    %c0_20 = arith.constant 0 : index
    %c0_21 = arith.constant 0 : index
    %26 = vector.load %arg6[%c0_18, %c0_19, %c0_20, %c0_21] : memref<1x1x2x1xf32, #tpu.memory_space<vmem>>, vector<1x1x2x1xf32>
    tpu.vector_store %arg6[%c0_18, %c0_19, %c0_20, %c0_21], %25 {strides = array<i32>} : memref<1x1x2x1xf32, #tpu.memory_space<vmem>>, vector<1x1x2x1xf32>,
    %27 = vector.shape_cast %24 : vector<2x1xf32> to vector<1x1x2x1xf32>
    %c0_22 = arith.constant 0 : index
    %c0_23 = arith.constant 0 : index
    %c0_24 = arith.constant 0 : index
    %c0_25 = arith.constant 0 : index
    %28 = vector.load %arg7[%c0_22, %c0_23, %c0_24, %c0_25] : memref<1x1x2x1xf32, #tpu.memory_space<vmem>>, vector<1x1x2x1xf32>
    tpu.vector_store %arg7[%c0_22, %c0_23, %c0_24, %c0_25], %27 {strides = array<i32>} : memref<1x1x2x1xf32, #tpu.memory_space<vmem>>, vector<1x1x2x1xf32>,
    return
  }
  func.func @transform_0(%arg0: i32, %arg1: i32) -> (i32, i32, i32, i32) {
    %c0_i32 = arith.constant 0 : i32
    %c0_i32_0 = arith.constant 0 : i32
    %c0_i32_1 = arith.constant 0 : i32
    return %arg0, %arg1, %c0_i32, %c0_i32_0 : i32, i32, i32, i32
  }
  func.func @transform_1(%arg0: i32, %arg1: i32) -> (i32, i32, i32) {
    %c0_i32 = arith.constant 0 : i32
    %c0_i32_0 = arith.constant 0 : i32
    %c0_i32_1 = arith.constant 0 : i32
    %c0_i32_2 = arith.constant 0 : i32
    return %c0_i32, %c0_i32_0, %c0_i32_1 : i32, i32, i32
  }
  func.func @transform_2(%arg0: i32, %arg1: i32) -> (i32, i32) {
    %c0_i32 = arith.constant 0 : i32
    %c0_i32_0 = arith.constant 0 : i32
    %c0_i32_1 = arith.constant 0 : i32
    return %c0_i32, %c0_i32_0 : i32, i32
  }
  func.func @transform_3(%arg0: i32, %arg1: i32) -> (i32, i32, i32) {
    %c0_i32 = arith.constant 0 : i32
    %c0_i32_0 = arith.constant 0 : i32
    return %arg0, %arg1, %c0_i32 : i32, i32, i32
  }
  func.func @transform_4(%arg0: i32, %arg1: i32) -> (i32, i32, i32, i32) {
    %c0_i32 = arith.constant 0 : i32
    %c0_i32_0 = arith.constant 0 : i32
    %c0_i32_1 = arith.constant 0 : i32
    return %arg0, %arg1, %c0_i32, %c0_i32_0 : i32, i32, i32, i32
  }
  func.func @transform_5(%arg0: i32, %arg1: i32) -> (i32, i32, i32, i32) {
    %c0_i32 = arith.constant 0 : i32
    %c0_i32_0 = arith.constant 0 : i32
    %c0_i32_1 = arith.constant 0 : i32
    return %arg0, %arg1, %c0_i32, %c0_i32_0 : i32, i32, i32, i32
  }
}

</mosaic_0001>

<bundles_post_ra>
// kernel: double_conv_forward.5
= control target key start
LH: loop header
LB: loop body
LE: loop exit
PB: predicated region body
PF: predicated region fallthrough
CT: control target
= control target key end

     0   :  { %s657_s21 = smov 0   ;;  %s659_s22 = smov 0   ;;  %s716_s0 = inlined_call_operand.vmem [shape: f32[2,64,128], index: 0, kind: input, shape index: {}, may-alias: {0,6}]   ;;  %s717_s1 = inlined_call_operand.vmem [shape: f32[2,1,2,1], index: 1, kind: input, shape index: {}]   ;;  %s718_s2 = inlined_call_operand.vmem [shape: f32[2,1,2,1], index: 2, kind: input, shape index: {}]   ;;  %s719_s3 = inlined_call_operand.vmem [shape: f32[2,128], index: 3, kind: input, shape index: {}]   ;;  %s720_s4 = inlined_call_operand.vmem [shape: f32[1,128], index: 4, kind: input, shape index: {}]   ;;  %s721_s5 = inlined_call_operand.vmem [shape: f32[1,128], index: 5, kind: input, shape index: {}]   ;;  %s722_s6 = inlined_call_operand.vmem [shape: f32[2,64,128], index: 6, kind: output, shape index: {}, may-alias: {0,6}]  }
   0x1   :  { %s661_s23 = smov 0  }
   0x2 LB: > { %s28_s24 = sadd.s32 1, %s615_s22  ;;  %p557_p0 = scmp.ge.s32.totalorder %s619_s23, 1  ;;  %s619_s23 = sphi %s661_s23, %s16_s23   ;;  %s615_s22 = sphi %s659_s22, %s724_s22   ;;  %s611_s21 = sphi %s657_s21, %s723_s21  }
   0x3   : > { %p30_p1 = scmp.ge.s32.totalorder %s28_s24, 2  ;;  %p251_p2 = scmp.lt.s32.totalorder %s619_s23, 3 }
   0x5   : > { %s726_s24 = smov (%p30_p1, %s28_s24), 0  ;;  %p252_p3 = pnand %p557_p0, %p251_p2 }
   0x6   : > { %p298_p4 = scmp.lt.s32.totalorder (!%p252_p3), %s611_s21, 1 }
   0x7   : > { %255 = sbr.rel (%p252_p3) target bundleno = 200 (0xc8), region = 44 }
   0xc   : > { %v621_v0 = vmov 0   ;;  %s728_s21 = smov (!%p298_p4, %s611_s21), 1  ;;  %v351_v16 = vld [vmem:[%s719_s3] sm:$0x3]  ;;  %vm358_vm3 = vcmask 1041408  }
   0xd   : > { %593 = vset.pattern.permute.xlu0 %v621_v0  ;;  %s560_s25 = sshll.u32 %s728_s21, 1  ;;  %s566_s10 = sshll.u32 %s728_s21, 6  ;;  %v387_v31 = vld [vmem:[%s720_s4] sm:$0x1] }
   0xe   : > { %s310_s28 = scalar_lea.vmem %s717_s1, %s560_s25  ;;  %s314_s7 = scalar_lea.vmem %s718_s2, %s560_s25  ;;  %v594_v46 = vld [vmem:[%s721_s5] ss:$0 sm:$0xff] }
   0xf   : > { %v333_v1 = vld [vmem:[%s310_s28] sm:$0x3]  ;;  %s305_s15 = scalar_lea.vmem %s716_s0, %s566_s10  ;;  %s323_s20 = scalar_lea.vmem %s722_s6, %s566_s10 }
  0x10   : > { %v334_v2 = vld [vmem:[%s314_s7] sm:$0x3]  ;;  %v335_v3 = vmul.f32 0.00390625, %v333_v1  ;;  %v326_v36 = vld [vmem:[%s305_s15 + $0x8] sm:$0xff]  ;;  %v327_v38 = vld [vmem:[%s305_s15 + $0x10] sm:$0xff] }
  0x11   : > { %v336_v4 = vmul.f32 0.00390625, %v334_v2  ;;  %v325_v35 = vld [vmem:[%s305_s15] sm:$0xff]  ;;  %v328_v39 = vld [vmem:[%s305_s15 + $0x18] sm:$0xff]  ;;  %v330_v41 = vld [vmem:[%s305_s15 + $0x28] sm:$0xff] }
  0x12   : > { %v337_v5 = vmul.f32 %v335_v3, %v335_v3  ;;  %v329_v40 = vld [vmem:[%s305_s15 + $0x20] sm:$0xff]  ;;  %v331_v42 = vld [vmem:[%s305_s15 + $0x30] sm:$0xff]  ;;  %v332_v43 = vld [vmem:[%s305_s15 + $0x38] sm:$0xff] }
  0x14   : > { %v338_v6 = vsub.f32 %v336_v4, %v337_v5 }
  0x16   : > { %v339_v7 = vmax.f32 %v338_v6, 0.0 }
  0x18   : > { %v340_v8 = vadd.f32 1e-05, %v339_v7 }
  0x1a   : > { %595 = vrsqrt.f32 %v340_v8  ;;  %vm347_vm0 = vweird.f32 %v340_v8 }
  0x20   : > { %v596_v9 = vpop.eup %595 }
  0x21   : > { %v342_v10 = vmul.f32 %v596_v9, %v340_v8  ;;  %vm348_vm1 = vweird.f32 %v596_v9 }
  0x22   : > { %vm349_vm2 = vmor %vm347_vm0, %vm348_vm1 }
  0x23   : > { %v343_v11 = vmul.f32 %v596_v9, %v342_v10 }
  0x25   : > { %v344_v12 = vmul.f32 0.5, %v343_v11 }
  0x27   : > { %v345_v13 = vsub.f32 1.5, %v344_v12 }
  0x29   : > { %v346_v14 = vmul.f32 %v596_v9, %v345_v13 }
  0x2b   : > { %v350_v15 = vsel %vm349_vm2, %v596_v9, %v346_v14 }
  0x2c   : > { %368 = vperm.xlu0 %593, %v350_v15  }
  0x34   : > { %354 = vperm.xlu0 %593, %v335_v3  }
  0x9e   : > { %v369_v17 = vpop.permute.xlu0 %368 }
  0x9f   : > { %v371_v18 = vmul.f32 %v369_v17, %v351_v16 }
  0xa1   : > { %v372_v19 = vsel %vm358_vm3, %v371_v18, 0.0 }
  0xa2   : > { %v373_v20 = vrot.slane %v372_v19, 4 }
  0xa4   : > { %v374_v21 = vadd.f32 %v373_v20, %v372_v19 }
  0xa6   : > { %v375_v22 = vrot.slane %v374_v21, 2  ;;  %v355_v23 = vpop.permute.xlu0 %354 }
  0xa7   : > { %v357_v24 = vmul.f32 %v355_v23, %v351_v16 }
  0xa8   : > { %v376_v25 = vadd.f32 %v375_v22, %v374_v21 }
  0xa9   : > { %v359_v26 = vsel %vm358_vm3, %v357_v24, 0.0 }
  0xaa   : > { %v377_v27 = vrot.slane %v376_v25, 1  ;;  %v360_v28 = vrot.slane %v359_v26, 4 }
  0xac   : > { %v361_v29 = vadd.f32 %v360_v28, %v359_v26  ;;  %v378_v30 = vadd.f32 %v377_v27, %v376_v25 }
  0xae   : > { %v362_v32 = vrot.slane %v361_v29, 2  ;;  %v388_v34 = vmul.f32 %v387_v31, %v378_v30 }
  0xb0   : > { %v363_v33 = vadd.f32 %v362_v32, %v361_v29  ;;  %v389_v45 = vperm.slane %v388_v34, 0 }
  0xb2   : > { %v364_v37 = vrot.slane %v363_v33, 1 }
  0xb4   : > { %v365_v44 = vadd.f32 %v364_v37, %v363_v33 }
  0xb6   : > { %v379_v47 = vsub.f32 %v325_v35, %v365_v44  ;;  %v380_v48 = vsub.f32 %v326_v36, %v365_v44  ;;  %v381_v49 = vsub.f32 %v327_v38, %v365_v44  ;;  %v382_v50 = vsub.f32 %v328_v39, %v365_v44 }
  0xb7   : > { %v383_v51 = vsub.f32 %v329_v40, %v365_v44  ;;  %v384_v52 = vsub.f32 %v330_v41, %v365_v44  ;;  %v385_v53 = vsub.f32 %v331_v42, %v365_v44  ;;  %v386_v54 = vsub.f32 %v332_v43, %v365_v44 }
  0xb8   : > { %v390_v55 = vmul.f32 %v389_v45, %v379_v47  ;;  %v391_v56 = vmul.f32 %v389_v45, %v380_v48  ;;  %v392_v57 = vmul.f32 %v389_v45, %v381_v49  ;;  %v393_v58 = vmul.f32 %v389_v45, %v382_v50 }
  0xb9   : > { %v394_v59 = vmul.f32 %v389_v45, %v383_v51  ;;  %v395_v60 = vmul.f32 %v389_v45, %v384_v52  ;;  %v396_v61 = vmul.f32 %v389_v45, %v385_v53  ;;  %v397_v62 = vmul.f32 %v389_v45, %v386_v54 }
  0xba   : > { %v402_v63 = vadd.f32 %v594_v46, %v390_v55  ;;  %v403_v0 = vadd.f32 %v594_v46, %v391_v56  ;;  %v404_v1 = vadd.f32 %v594_v46, %v392_v57  ;;  %v405_v2 = vadd.f32 %v594_v46, %v393_v58 }
  0xbb   : > { %v406_v3 = vadd.f32 %v594_v46, %v394_v59  ;;  %v407_v4 = vadd.f32 %v594_v46, %v395_v60  ;;  %v408_v5 = vadd.f32 %v594_v46, %v396_v61  ;;  %v409_v6 = vadd.f32 %v594_v46, %v397_v62 }
  0xbc   : > { %vm410_vm4 = vcmp.gt.f32.partialorder %v402_v63, 0.0  ;;  %vm411_vm5 = vcmp.gt.f32.partialorder %v403_v0, 0.0  ;;  %vm412_vm6 = vcmp.gt.f32.partialorder %v404_v1, 0.0  ;;  %vm413_vm7 = vcmp.gt.f32.partialorder %v405_v2, 0.0 }
  0xbd   : > { %vm414_vm8 = vcmp.gt.f32.partialorder %v406_v3, 0.0  ;;  %v418_v7 = vmul.f32 0.01, %v402_v63  ;;  %v419_v8 = vmul.f32 0.01, %v403_v0  ;;  %vm415_vm9 = vcmp.gt.f32.partialorder %v407_v4, 0.0 }
  0xbe   : > { %v420_v9 = vmul.f32 0.01, %v404_v1  ;;  %v421_v10 = vmul.f32 0.01, %v405_v2  ;;  %v422_v11 = vmul.f32 0.01, %v406_v3 }
  0xbf   : > { %v423_v12 = vmul.f32 0.01, %v407_v4  ;;  %v424_v13 = vmul.f32 0.01, %v408_v5  ;;  %v426_v14 = vsel %vm410_vm4, %v402_v63, %v418_v7  ;;  %v427_v15 = vsel %vm411_vm5, %v403_v0, %v419_v8 }
  0xc0   : > { %vm416_vm10 = vcmp.gt.f32.partialorder %v408_v5, 0.0  ;;  %v425_v16 = vmul.f32 0.01, %v409_v6  ;;  %v428_v17 = vsel %vm412_vm6, %v404_v1, %v420_v9  ;;  %v429_v18 = vsel %vm413_vm7, %v405_v2, %v421_v10  ;;  %434 = vst [vmem:[%s323_s20] sm:$0xff] %v426_v14 }
  0xc1   : > { %vm417_vm11 = vcmp.gt.f32.partialorder %v409_v6, 0.0  ;;  %v430_v19 = vsel %vm414_vm8, %v406_v3, %v422_v11  ;;  %435 = vst [vmem:[%s323_s20 + $0x8] sm:$0xff] %v427_v15  ;;  %v431_v20 = vsel %vm415_vm9, %v407_v4, %v423_v12  ;;  %v432_v21 = vsel %vm416_vm10, %v408_v5, %v424_v13 }
  0xc2   : > { %436 = vst [vmem:[%s323_s20 + $0x10] sm:$0xff] %v428_v17  ;;  %v433_v22 = vsel %vm417_vm11, %v409_v6, %v425_v16 }
  0xc3   : > { %437 = vst [vmem:[%s323_s20 + $0x18] sm:$0xff] %v429_v18 }
  0xc4   : > { %438 = vst [vmem:[%s323_s20 + $0x20] sm:$0xff] %v430_v19 }
  0xc5   : > { %439 = vst [vmem:[%s323_s20 + $0x28] sm:$0xff] %v431_v20 }
  0xc6   : > { %440 = vst [vmem:[%s323_s20 + $0x30] sm:$0xff] %v432_v21 }
  0xc7   : > { %441 = vst [vmem:[%s323_s20 + $0x38] sm:$0xff] %v433_v22 }
  0xc8 PF: > { %s16_s23 = sadd.s32 1, %s619_s23   ;;  %s723_s21 = smov %s615_s22 }
  0xc9   : > { %p13_p5 = scmp.ge.s32.totalorder %s16_s23, 4   ;;  %s724_s22 = smov %s726_s24 }
  0xcb   :  { %15 = sbr.rel (!%p13_p5) target bundleno = 2 (0x2), region = 80 }

// kernel: double_conv_forward.4
= control target key start
LH: loop header
LB: loop body
LE: loop exit
PB: predicated region body
PF: predicated region fallthrough
CT: control target
= control target key end

     0   :  { %s733_s18 = smov 0   ;;  %s735_s19 = smov 0   ;;  %s806_s0 = inlined_call_operand.vmem [shape: f32[2,8,8,36], index: 0, kind: input, shape index: {}]   ;;  %s807_s1 = inlined_call_operand.vmem [shape: f32[1,36,128], index: 1, kind: input, shape index: {}]   ;;  %s808_s2 = inlined_call_operand.vmem [shape: f32[2,128], index: 2, kind: input, shape index: {}]   ;;  %s809_s3 = inlined_call_operand.vmem [shape: f32[2,64,128], index: 3, kind: output, shape index: {0}]   ;;  %s810_s4 = inlined_call_operand.vmem [shape: f32[2,1,2,1], index: 4, kind: output, shape index: {1}]   ;;  %s811_s5 = inlined_call_operand.vmem [shape: f32[2,1,2,1], index: 5, kind: output, shape index: {2}]  }
   0x1   :  { %s737_s20 = smov 0  }
   0x2 LB: > { %s28_s21 = sadd.s32 1, %s697_s19  ;;  %p620_p0 = scmp.ge.s32.totalorder %s701_s20, 1  ;;  %s701_s20 = sphi %s737_s20, %s16_s20   ;;  %s697_s19 = sphi %s735_s19, %s813_s19   ;;  %s693_s18 = sphi %s733_s18, %s812_s18  }
   0x3   : > { %p30_p1 = scmp.ge.s32.totalorder %s28_s21, 2  ;;  %p217_p2 = scmp.lt.s32.totalorder %s701_s20, 3 }
   0x5   : > { %s815_s21 = smov (%p30_p1, %s28_s21), 0  ;;  %p218_p3 = pnand %p620_p0, %p217_p2 }
   0x6   : > { %p268_p4 = scmp.lt.s32.totalorder (!%p218_p3), %s693_s18, 1 }
   0x7   : > { %221 = sbr.rel (%p218_p3) target bundleno = 310 (0x136), region = 32 }
   0xc   : > { %v313_v0 = vld [vmem:[%s807_s1 + $0x20] sm:$0xf]  ;;  %vm339_vm0 = vcmask 1043456   ;;  %v312_v1 = vld [vmem:[%s807_s1 + $0x18] sm:$0xff]  ;;  %v311_v2 = vld [vmem:[%s807_s1 + $0x10] sm:$0xff]  ;;  %s817_s18 = smov (!%p268_p4, %s693_s18), 1 }
   0xd   : > { %627 = vmatpush.msk.msra.mxu0 %vm339_vm0, %v313_v0  ;;  %641 = vmatpush.msk.msra.mxu2 %vm339_vm0, %v313_v0  ;;  %v310_v3 = vld [vmem:[%s807_s1 + $0x8] sm:$0xff]  ;;  %s638_s30 = sshll.u32 %s817_s18, 6  ;;  %v309_v4 = vld [vmem:[%s807_s1] sm:$0xff]  ;;  %vm314_vm1 = vcmask 293888   ;;  %vm436_vm2 = vcmask 1041408   ;;  %s625_s16 = sshll.u32 %s817_s18, 1 }
   0xe   : > { %640 = vmatpush.msk.msra.mxu1 %vm339_vm0, %v313_v0  ;;  %642 = vmatpush.msk.msra.mxu3 %vm339_vm0, %v313_v0  ;;  %s275_s8 = scalar_lea.vmem %s806_s0, %s638_s30  ;;  %s285_s13 = scalar_lea.vmem %s809_s3, %s638_s30  ;;  %v434_v52 = vld [vmem:[%s808_s2] sm:$0x3]  ;;  %vm444_vm3 = vcmask 1024  }
   0xf   : > { %355 = vmatpush.msra.mxu0 %v312_v1  ;;  %644 = vmatpush.msra.mxu2 %v312_v1  ;;  %v301_v5 = vld [vmem:[%s275_s8] sm:$0xff]  ;;  %v303_v7 = vld [vmem:[%s275_s8 + $0x10] sm:$0xff]  ;;  %v302_v9 = vld [vmem:[%s275_s8 + $0x8] sm:$0xff]  ;;  %s293_s23 = scalar_lea.vmem %s810_s4, %s625_s16  ;;  %s300_s26 = scalar_lea.vmem %s811_s5, %s625_s16 }
  0x10   : > { %643 = vmatpush.msra.mxu1 %v312_v1  ;;  %645 = vmatpush.msra.mxu3 %v312_v1  ;;  %v305_v6 = vld [vmem:[%s275_s8 + $0x20] sm:$0xff]  ;;  %v307_v8 = vld [vmem:[%s275_s8 + $0x30] sm:$0xff]  ;;  %v306_v10 = vld [vmem:[%s275_s8 + $0x28] sm:$0xff] }
  0x11   : > { %356 = vmatpush.msra.mxu0 %v311_v2  ;;  %647 = vmatpush.msra.mxu2 %v311_v2  ;;  %v304_v11 = vld [vmem:[%s275_s8 + $0x18] sm:$0xff] }
  0x12   : > { %646 = vmatpush.msra.mxu1 %v311_v2  ;;  %648 = vmatpush.msra.mxu3 %v311_v2  ;;  %v308_v12 = vld [vmem:[%s275_s8 + $0x38] sm:$0xff] }
  0x13   : > { %357 = vmatpush.msra.mxu0 %v310_v3  ;;  %650 = vmatpush.msra.mxu2 %v310_v3 }
  0x14   : > { %649 = vmatpush.msra.mxu1 %v310_v3  ;;  %651 = vmatpush.msra.mxu3 %v310_v3 }
  0x15   : > { %358 = vmatpush.msra.mxu0 %v309_v4  ;;  %653 = vmatpush.msra.mxu2 %v309_v4 }
  0x16   : > { %628 = vmatmul.msk.f32.vlgmr.msra.gmra.mxu0 %vm314_vm1, %v301_v5  ;;  %632 = vmatmul.msk.f32.vlgmr.msra.gmra.mxu2 %vm314_vm1, %v305_v6 }
  0x17   : > { %652 = vmatpush.msra.mxu1 %v309_v4  ;;  %654 = vmatpush.msra.mxu3 %v309_v4 }
  0x18   : > { %630 = vmatmul.msk.f32.vlgmr.msra.gmra.mxu1 %vm314_vm1, %v303_v7  ;;  %634 = vmatmul.msk.f32.vlgmr.msra.gmra.mxu3 %vm314_vm1, %v307_v8 }
  0x1e   : > { %629 = vmatmul.msk.f32.gmra.mxu0 %vm314_vm1, %v302_v9  ;;  %633 = vmatmul.msk.f32.gmra.mxu2 %vm314_vm1, %v306_v10 }
  0x20   : > { %631 = vmatmul.msk.f32.gmra.mxu1 %vm314_vm1, %v304_v11  ;;  %635 = vmatmul.msk.f32.gmra.mxu3 %vm314_vm1, %v308_v12 }
  0x93   : > { %v360_v13 = vpop.f32.mrf.mxu0 }
  0x94   : > { %384 = vst [vmem:[%s285_s13] sm:$0xff] %v360_v13  ;;  %v413_v19 = vmul.f32 %v360_v13, %v360_v13 }
  0x95   : > { %v366_v14 = vpop.f32.mrf.mxu1 }
  0x96   : > { %386 = vst [vmem:[%s285_s13 + $0x10] sm:$0xff] %v366_v14  ;;  %v415_v23 = vmul.f32 %v366_v14, %v366_v14 }
  0x99   : > { %v372_v15 = vpop.f32.mrf.mxu2 }
  0x9a   : > { %388 = vst [vmem:[%s285_s13 + $0x20] sm:$0xff] %v372_v15  ;;  %v417_v30 = vmul.f32 %v372_v15, %v372_v15 }
  0x9b   : > { %v363_v16 = vpop.f32.mrf.mxu0  ;;  %v378_v17 = vpop.f32.mrf.mxu3 }
  0x9c   : > { %385 = vst [vmem:[%s285_s13 + $0x8] sm:$0xff] %v363_v16  ;;  %v400_v18 = vadd.f32 %v363_v16, %v360_v13  ;;  %v414_v20 = vmul.f32 %v363_v16, %v363_v16  ;;  %v419_v37 = vmul.f32 %v378_v17, %v378_v17 }
  0x9d   : > { %v369_v21 = vpop.f32.mrf.mxu1  ;;  %390 = vst [vmem:[%s285_s13 + $0x30] sm:$0xff] %v378_v17 }
  0x9e   : > { %387 = vst [vmem:[%s285_s13 + $0x18] sm:$0xff] %v369_v21  ;;  %v401_v22 = vadd.f32 %v400_v18, %v366_v14  ;;  %v416_v24 = vmul.f32 %v369_v21, %v369_v21  ;;  %v421_v25 = vadd.f32 %v414_v20, %v413_v19 }
  0xa0   : > { %v402_v26 = vadd.f32 %v401_v22, %v369_v21  ;;  %v422_v27 = vadd.f32 %v421_v25, %v415_v23 }
  0xa1   : > { %v375_v28 = vpop.f32.mrf.mxu2 }
  0xa2   : > { %389 = vst [vmem:[%s285_s13 + $0x28] sm:$0xff] %v375_v28  ;;  %v403_v29 = vadd.f32 %v402_v26, %v372_v15  ;;  %v418_v31 = vmul.f32 %v375_v28, %v375_v28  ;;  %v423_v32 = vadd.f32 %v422_v27, %v416_v24 }
  0xa3   : > { %v381_v33 = vpop.f32.mrf.mxu3 }
  0xa4   : > { %391 = vst [vmem:[%s285_s13 + $0x38] sm:$0xff] %v381_v33  ;;  %v404_v34 = vadd.f32 %v403_v29, %v375_v28  ;;  %v424_v35 = vadd.f32 %v423_v32, %v417_v30  ;;  %v420_v38 = vmul.f32 %v381_v33, %v381_v33 }
  0xa6   : > { %v405_v36 = vadd.f32 %v404_v34, %v378_v17  ;;  %v425_v39 = vadd.f32 %v424_v35, %v418_v31 }
  0xa8   : > { %v406_v40 = vadd.f32 %v405_v36, %v381_v33  ;;  %v426_v41 = vadd.f32 %v425_v39, %v419_v37 }
  0xaa   : > { %v407_v42 = vrot.slane %v406_v40, 4  ;;  %v427_v43 = vadd.f32 %v426_v41, %v420_v38 }
  0xac   : > { %v408_v44 = vadd.f32 %v407_v42, %v406_v40  ;;  %v428_v45 = vrot.slane %v427_v43, 4 }
  0xae   : > { %v409_v46 = vrot.slane %v408_v44, 2  ;;  %v429_v47 = vadd.f32 %v428_v45, %v427_v43 }
  0xb0   : > { %v410_v48 = vadd.f32 %v409_v46, %v408_v44  ;;  %v430_v49 = vrot.slane %v429_v47, 2 }
  0xb2   : > { %v411_v50 = vrot.slane %v410_v48, 1  ;;  %v431_v51 = vadd.f32 %v430_v49, %v429_v47 }
  0xb4   : > { %v412_v53 = vadd.f32 %v411_v50, %v410_v48  ;;  %v432_v54 = vrot.slane %v431_v51, 1 }
  0xb6   : > { %v435_v55 = vmul.f32 %v434_v52, %v412_v53  ;;  %v433_v57 = vadd.f32 %v432_v54, %v431_v51 }
  0xb8   : > { %v437_v56 = vsel %vm436_vm2, %v435_v55, 0.0  ;;  %v440_v58 = vmul.f32 %v434_v52, %v433_v57 }
  0xb9   : > { %438 = vadd.xlane.f32.xlu0 %v437_v56 }
  0xba   : > { %v441_v59 = vsel %vm436_vm2, %v440_v58, 0.0 }
  0xc1   : > { %442 = vadd.xlane.f32.xlu0 %v441_v59 }
 0x12c   : > { %v439_v60 = vpop.xlane.xlu0 %438 }
 0x12d   : > { %445 = vst.msk [vmem:[%s293_s23] sm:$0x3] %vm444_vm3, %v439_v60 }
 0x134   : > { %v443_v61 = vpop.xlane.xlu0 %442 }
 0x135   : > { %446 = vst.msk [vmem:[%s300_s26] sm:$0x3] %vm444_vm3, %v443_v61 }
 0x136 PF: > { %s16_s20 = sadd.s32 1, %s701_s20   ;;  %s812_s18 = smov %s697_s19 }
 0x137   : > { %p13_p5 = scmp.ge.s32.totalorder %s16_s20, 4   ;;  %s813_s19 = smov %s815_s21 }
 0x139   :  { %15 = sbr.rel (!%p13_p5) target bundleno = 2 (0x2), region = 86 }

// kernel: double_conv_forward.6
= control target key start
LH: loop header
LB: loop body
LE: loop exit
PB: predicated region body
PF: predicated region fallthrough
CT: control target
= control target key end

     0   :  { %s744_s18 = smov 0   ;;  %s746_s19 = smov 0   ;;  %s829_s0 = inlined_call_operand.vmem [shape: f32[2,8,8,72], index: 0, kind: input, shape index: {}]   ;;  %s830_s1 = inlined_call_operand.vmem [shape: f32[1,72,128], index: 1, kind: input, shape index: {}]   ;;  %s831_s2 = inlined_call_operand.vmem [shape: f32[2,128], index: 2, kind: input, shape index: {}]   ;;  %s832_s3 = inlined_call_operand.vmem [shape: f32[2,64,128], index: 3, kind: output, shape index: {0}]   ;;  %s833_s4 = inlined_call_operand.vmem [shape: f32[2,1,2,1], index: 4, kind: output, shape index: {1}]   ;;  %s834_s5 = inlined_call_operand.vmem [shape: f32[2,1,2,1], index: 5, kind: output, shape index: {2}]  }
   0x1   :  { %s748_s20 = smov 0  }
   0x2 LB: > { %s28_s21 = sadd.s32 1, %s708_s19  ;;  %p620_p0 = scmp.ge.s32.totalorder %s712_s20, 1  ;;  %s712_s20 = sphi %s748_s20, %s16_s20   ;;  %s708_s19 = sphi %s746_s19, %s836_s19   ;;  %s704_s18 = sphi %s744_s18, %s835_s18  }
   0x3   : > { %p30_p1 = scmp.ge.s32.totalorder %s28_s21, 2  ;;  %p217_p2 = scmp.lt.s32.totalorder %s712_s20, 3 }
   0x5   : > { %s838_s21 = smov (%p30_p1, %s28_s21), 0  ;;  %p218_p3 = pnand %p620_p0, %p217_p2 }
   0x6   : > { %p268_p4 = scmp.lt.s32.totalorder (!%p218_p3), %s704_s18, 1 }
   0x7   : > { %221 = sbr.rel (%p218_p3) target bundleno = 318 (0x13e), region = 32 }
   0xc   : > { %v317_v0 = vld [vmem:[%s830_s1 + $0x40] sm:$0xff]  ;;  %v316_v1 = vld [vmem:[%s830_s1 + $0x38] sm:$0xff]  ;;  %v315_v2 = vld [vmem:[%s830_s1 + $0x30] sm:$0xff]  ;;  %s840_s18 = smov (!%p268_p4, %s704_s18), 1  ;;  %vm318_vm0 = vcmask 588800   ;;  %vm436_vm1 = vcmask 1041408  }
   0xd   : > { %350 = vmatpush.msra.mxu0 %v317_v0  ;;  %640 = vmatpush.msra.mxu2 %v317_v0  ;;  %v314_v3 = vld [vmem:[%s830_s1 + $0x28] sm:$0xff]  ;;  %v313_v4 = vld [vmem:[%s830_s1 + $0x20] sm:$0xff]  ;;  %v312_v5 = vld [vmem:[%s830_s1 + $0x18] sm:$0xff]  ;;  %s637_s9 = sshll.u32 %s840_s18, 6  ;;  %s625_s28 = sshll.u32 %s840_s18, 1  ;;  %vm444_vm2 = vcmask 1024  }
   0xe   : > { %639 = vmatpush.msra.mxu1 %v317_v0  ;;  %641 = vmatpush.msra.mxu3 %v317_v0  ;;  %v311_v6 = vld [vmem:[%s830_s1 + $0x10] sm:$0xff]  ;;  %v310_v7 = vld [vmem:[%s830_s1 + $0x8] sm:$0xff]  ;;  %s275_s16 = scalar_lea.vmem %s829_s0, %s637_s9  ;;  %v309_v8 = vld [vmem:[%s830_s1] sm:$0xff]  ;;  %s285_s25 = scalar_lea.vmem %s832_s3, %s637_s9 }
   0xf   : > { %351 = vmatpush.msra.mxu0 %v316_v1  ;;  %643 = vmatpush.msra.mxu2 %v316_v1  ;;  %v301_v9 = vld [vmem:[%s275_s16] sm:$0xff]  ;;  %v303_v11 = vld [vmem:[%s275_s16 + $0x10] sm:$0xff]  ;;  %v302_v13 = vld [vmem:[%s275_s16 + $0x8] sm:$0xff]  ;;  %s293_s6 = scalar_lea.vmem %s833_s4, %s625_s28  ;;  %s300_s9 = scalar_lea.vmem %s834_s5, %s625_s28 }
  0x10   : > { %642 = vmatpush.msra.mxu1 %v316_v1  ;;  %644 = vmatpush.msra.mxu3 %v316_v1  ;;  %v305_v10 = vld [vmem:[%s275_s16 + $0x20] sm:$0xff]  ;;  %v307_v12 = vld [vmem:[%s275_s16 + $0x30] sm:$0xff]  ;;  %v306_v14 = vld [vmem:[%s275_s16 + $0x28] sm:$0xff] }
  0x11   : > { %352 = vmatpush.msra.mxu0 %v315_v2  ;;  %646 = vmatpush.msra.mxu2 %v315_v2  ;;  %v304_v15 = vld [vmem:[%s275_s16 + $0x18] sm:$0xff]  ;;  %v434_v56 = vld [vmem:[%s831_s2] sm:$0x3] }
  0x12   : > { %645 = vmatpush.msra.mxu1 %v315_v2  ;;  %647 = vmatpush.msra.mxu3 %v315_v2  ;;  %v308_v16 = vld [vmem:[%s275_s16 + $0x38] sm:$0xff] }
  0x13   : > { %353 = vmatpush.msra.mxu0 %v314_v3  ;;  %649 = vmatpush.msra.mxu2 %v314_v3 }
  0x14   : > { %648 = vmatpush.msra.mxu1 %v314_v3  ;;  %650 = vmatpush.msra.mxu3 %v314_v3 }
  0x15   : > { %354 = vmatpush.msra.mxu0 %v313_v4  ;;  %652 = vmatpush.msra.mxu2 %v313_v4 }
  0x16   : > { %651 = vmatpush.msra.mxu1 %v313_v4  ;;  %653 = vmatpush.msra.mxu3 %v313_v4 }
  0x17   : > { %355 = vmatpush.msra.mxu0 %v312_v5  ;;  %655 = vmatpush.msra.mxu2 %v312_v5 }
  0x18   : > { %654 = vmatpush.msra.mxu1 %v312_v5  ;;  %656 = vmatpush.msra.mxu3 %v312_v5 }
  0x19   : > { %356 = vmatpush.msra.mxu0 %v311_v6  ;;  %658 = vmatpush.msra.mxu2 %v311_v6 }
  0x1a   : > { %657 = vmatpush.msra.mxu1 %v311_v6  ;;  %659 = vmatpush.msra.mxu3 %v311_v6 }
  0x1b   : > { %357 = vmatpush.msra.mxu0 %v310_v7  ;;  %661 = vmatpush.msra.mxu2 %v310_v7 }
  0x1c   : > { %660 = vmatpush.msra.mxu1 %v310_v7  ;;  %662 = vmatpush.msra.mxu3 %v310_v7 }
  0x1d   : > { %358 = vmatpush.msra.mxu0 %v309_v8  ;;  %664 = vmatpush.msra.mxu2 %v309_v8 }
  0x1e   : > { %627 = vmatmul.msk.f32.vlgmr.msra.gmra.mxu0 %vm318_vm0, %v301_v9  ;;  %631 = vmatmul.msk.f32.vlgmr.msra.gmra.mxu2 %vm318_vm0, %v305_v10 }
  0x1f   : > { %663 = vmatpush.msra.mxu1 %v309_v8  ;;  %665 = vmatpush.msra.mxu3 %v309_v8 }
  0x20   : > { %629 = vmatmul.msk.f32.vlgmr.msra.gmra.mxu1 %vm318_vm0, %v303_v11  ;;  %633 = vmatmul.msk.f32.vlgmr.msra.gmra.mxu3 %vm318_vm0, %v307_v12 }
  0x26   : > { %628 = vmatmul.msk.f32.gmra.mxu0 %vm318_vm0, %v302_v13  ;;  %632 = vmatmul.msk.f32.gmra.mxu2 %vm318_vm0, %v306_v14 }
  0x28   : > { %630 = vmatmul.msk.f32.gmra.mxu1 %vm318_vm0, %v304_v15  ;;  %634 = vmatmul.msk.f32.gmra.mxu3 %vm318_vm0, %v308_v16 }
  0x9b   : > { %v360_v17 = vpop.f32.mrf.mxu0 }
  0x9c   : > { %384 = vst [vmem:[%s285_s25] sm:$0xff] %v360_v17  ;;  %v413_v23 = vmul.f32 %v360_v17, %v360_v17 }
  0x9d   : > { %v366_v18 = vpop.f32.mrf.mxu1 }
  0x9e   : > { %386 = vst [vmem:[%s285_s25 + $0x10] sm:$0xff] %v366_v18  ;;  %v415_v27 = vmul.f32 %v366_v18, %v366_v18 }
  0xa1   : > { %v372_v19 = vpop.f32.mrf.mxu2 }
  0xa2   : > { %388 = vst [vmem:[%s285_s25 + $0x20] sm:$0xff] %v372_v19  ;;  %v417_v34 = vmul.f32 %v372_v19, %v372_v19 }
  0xa3   : > { %v363_v20 = vpop.f32.mrf.mxu0  ;;  %v378_v21 = vpop.f32.mrf.mxu3 }
  0xa4   : > { %385 = vst [vmem:[%s285_s25 + $0x8] sm:$0xff] %v363_v20  ;;  %v400_v22 = vadd.f32 %v363_v20, %v360_v17  ;;  %v414_v24 = vmul.f32 %v363_v20, %v363_v20  ;;  %v419_v41 = vmul.f32 %v378_v21, %v378_v21 }
  0xa5   : > { %v369_v25 = vpop.f32.mrf.mxu1  ;;  %390 = vst [vmem:[%s285_s25 + $0x30] sm:$0xff] %v378_v21 }
  0xa6   : > { %387 = vst [vmem:[%s285_s25 + $0x18] sm:$0xff] %v369_v25  ;;  %v401_v26 = vadd.f32 %v400_v22, %v366_v18  ;;  %v416_v28 = vmul.f32 %v369_v25, %v369_v25  ;;  %v421_v29 = vadd.f32 %v414_v24, %v413_v23 }
  0xa8   : > { %v402_v30 = vadd.f32 %v401_v26, %v369_v25  ;;  %v422_v31 = vadd.f32 %v421_v29, %v415_v27 }
  0xa9   : > { %v375_v32 = vpop.f32.mrf.mxu2 }
  0xaa   : > { %389 = vst [vmem:[%s285_s25 + $0x28] sm:$0xff] %v375_v32  ;;  %v403_v33 = vadd.f32 %v402_v30, %v372_v19  ;;  %v418_v35 = vmul.f32 %v375_v32, %v375_v32  ;;  %v423_v36 = vadd.f32 %v422_v31, %v416_v28 }
  0xab   : > { %v381_v37 = vpop.f32.mrf.mxu3 }
  0xac   : > { %391 = vst [vmem:[%s285_s25 + $0x38] sm:$0xff] %v381_v37  ;;  %v404_v38 = vadd.f32 %v403_v33, %v375_v32  ;;  %v424_v39 = vadd.f32 %v423_v36, %v417_v34  ;;  %v420_v42 = vmul.f32 %v381_v37, %v381_v37 }
  0xae   : > { %v405_v40 = vadd.f32 %v404_v38, %v378_v21  ;;  %v425_v43 = vadd.f32 %v424_v39, %v418_v35 }
  0xb0   : > { %v406_v44 = vadd.f32 %v405_v40, %v381_v37  ;;  %v426_v45 = vadd.f32 %v425_v43, %v419_v41 }
  0xb2   : > { %v407_v46 = vrot.slane %v406_v44, 4  ;;  %v427_v47 = vadd.f32 %v426_v45, %v420_v42 }
  0xb4   : > { %v408_v48 = vadd.f32 %v407_v46, %v406_v44  ;;  %v428_v49 = vrot.slane %v427_v47, 4 }
  0xb6   : > { %v409_v50 = vrot.slane %v408_v48, 2  ;;  %v429_v51 = vadd.f32 %v428_v49, %v427_v47 }
  0xb8   : > { %v410_v52 = vadd.f32 %v409_v50, %v408_v48  ;;  %v430_v53 = vrot.slane %v429_v51, 2 }
  0xba   : > { %v411_v54 = vrot.slane %v410_v52, 1  ;;  %v431_v55 = vadd.f32 %v430_v53, %v429_v51 }
  0xbc   : > { %v412_v57 = vadd.f32 %v411_v54, %v410_v52  ;;  %v432_v58 = vrot.slane %v431_v55, 1 }
  0xbe   : > { %v435_v59 = vmul.f32 %v434_v56, %v412_v57  ;;  %v433_v61 = vadd.f32 %v432_v58, %v431_v55 }
  0xc0   : > { %v437_v60 = vsel %vm436_vm1, %v435_v59, 0.0  ;;  %v440_v62 = vmul.f32 %v434_v56, %v433_v61 }
  0xc1   : > { %438 = vadd.xlane.f32.xlu0 %v437_v60 }
  0xc2   : > { %v441_v63 = vsel %vm436_vm1, %v440_v62, 0.0 }
  0xc9   : > { %442 = vadd.xlane.f32.xlu0 %v441_v63 }
 0x134   : > { %v439_v0 = vpop.xlane.xlu0 %438 }
 0x135   : > { %445 = vst.msk [vmem:[%s293_s6] sm:$0x3] %vm444_vm2, %v439_v0 }
 0x13c   : > { %v443_v1 = vpop.xlane.xlu0 %442 }
 0x13d   : > { %446 = vst.msk [vmem:[%s300_s9] sm:$0x3] %vm444_vm2, %v443_v1 }
 0x13e PF: > { %s16_s20 = sadd.s32 1, %s712_s20   ;;  %s835_s18 = smov %s708_s19 }
 0x13f   : > { %p13_p5 = scmp.ge.s32.totalorder %s16_s20, 4   ;;  %s836_s19 = smov %s838_s21 }
 0x141   :  { %15 = sbr.rel (!%p13_p5) target bundleno = 2 (0x2), region = 86 }

</bundles_post_ra>
